<compile_context>
chip_gen: v7x
topology: tpu7x:2x2x1
jax: 0.10.0
libtpu: 0.0.40
codegen_flags: <defaults>
</compile_context>

<pallas_src>
import jax
import jax.numpy as jnp
from jax.experimental import pallas as pl


# ---------------------------------------------------------------------------
# Fused Pallas kernel
#   keys      = box_flat @ obj_w + obj_b                     (encoder stub)
#   x         = [pre_box @ pre_w + pre_b | hm @ hm_w + hm_b] (decoder front-end)
#   gates     = [x|h] @ W_gru_fused + b_gru_fused            (r,z in one block,
#                                                             gi_n / gh_n split)
#   h'        = (1-z)*n + z*h
#   s1[b,k]   = v1 . tanh(W1a keys[b,k] + W1b h'[b])  -> softmax_k -> attns
#   new_q[b]  = sum_k attns[b,k] keys[b,k]
#   s2[b,k]   = v2 . tanh(W2a keys[b,k] + W2b new_q[b])      (returned energies)
# ---------------------------------------------------------------------------
def _strategy_attention_kernel(box_ref, pre_ref, hm_ref, h_ref,
                               wblob_ref, bblob_ref,
                               scores_ref, hout_ref):
    """box_ref [B*K, BD]; pre_ref [B, BD]; hm_ref [B, HM]; h_ref [B, H];
    wblob_ref [R, 10H] packed weights; bblob_ref [1, 8H] packed biases/v;
    outputs: scores [B, K] (lane-major), h_new [B, H]."""
    BK, BD = box_ref.shape
    B, H = h_ref.shape
    K = BK // B
    HM = hm_ref.shape[1]
    half = H // 2
    f32 = jnp.float32

    # ---- static slices of the packed parameter blobs (VMEM views) ----
    gru_w = wblob_ref[0:2 * H, 0:4 * H]                 # [2H, 4H]
    wk    = wblob_ref[0:H, 4 * H:6 * H]                 # [H, 2H]  (stage1|stage2 key proj)
    w1q   = wblob_ref[0:H, 6 * H:7 * H]                 # [H, H]
    w2q   = wblob_ref[0:H, 7 * H:8 * H]                 # [H, H]
    obj_w = wblob_ref[0:BD, 8 * H:9 * H]                # [BD, H]
    pre_w = wblob_ref[0:BD, 9 * H:9 * H + half]         # [BD, H/2]
    hm_w  = wblob_ref[0:HM, 9 * H + half:10 * H]        # [HM, H/2]

    gru_b = bblob_ref[:, 0:4 * H]                       # [1, 4H]
    obj_b = bblob_ref[:, 4 * H:5 * H]                   # [1, H]
    pre_b = bblob_ref[:, 5 * H:5 * H + half]            # [1, H/2]
    hm_b  = bblob_ref[:, 5 * H + half:6 * H]            # [1, H/2]
    v1    = bblob_ref[:, 6 * H:7 * H]                   # [1, H]
    v2    = bblob_ref[:, 7 * H:8 * H]                   # [1, H]

    # ---- encoder stubs: keys (== values) and decoder input ----
    keys_flat = jnp.dot(box_ref[...], obj_w, preferred_element_type=f32) + obj_b   # [B*K, H]
    keys = keys_flat.reshape(B, K, H)                                              # free sublane split
    pre_vec = jnp.dot(pre_ref[...], pre_w, preferred_element_type=f32) + pre_b     # [B, H/2]
    hm_vec = jnp.dot(hm_ref[...], hm_w, preferred_element_type=f32) + hm_b         # [B, H/2]
    x = jnp.concatenate([pre_vec, hm_vec], axis=1)                                 # [B, H]

    # ---- single-step GRU: all three gates from ONE fused matmul ----
    h = h_ref[...]                                                                 # [B, H]
    xh = jnp.concatenate([x, h], axis=1)                                           # [B, 2H]
    gates = jnp.dot(xh, gru_w, preferred_element_type=f32) + gru_b                 # [B, 4H]
    r = jax.nn.sigmoid(gates[:, 0:H])
    z = jax.nn.sigmoid(gates[:, H:2 * H])
    n = jnp.tanh(gates[:, 2 * H:3 * H] + r * gates[:, 3 * H:4 * H])                # b_hn inside r*(.)
    h_new = (1.0 - z) * n + z * h                                                  # [B, H]
    hout_ref[...] = h_new

    # ---- two-stage additive attention, fully batched ----
    kp = jnp.dot(keys_flat, wk, preferred_element_type=f32)                        # [B*K, 2H]
    kp1 = kp[:, 0:H].reshape(B, K, H)
    kp2 = kp[:, H:2 * H].reshape(B, K, H)

    # stage 1: scores over keys, query = GRU output
    q1 = jnp.dot(h_new, w1q, preferred_element_type=f32)                           # [B, H]
    t1 = jnp.tanh(kp1 + q1[:, None, :])                                            # [B, K, H]
    s1 = jnp.sum(t1 * v1, axis=-1, keepdims=True)                                  # [B, K, 1]

    # softmax over keys (PyTorch softmax(dim=2)), max-stabilized, EUP reciprocal
    m = jnp.max(s1, axis=1, keepdims=True)                                         # [B, 1, 1]
    e = jnp.exp(s1 - m)
    denom = jnp.sum(e, axis=1, keepdims=True)
    attns = e * pl.reciprocal(denom, approx=True)                                  # [B, K, 1]

    # weighted sum of values (= keys)
    new_q = jnp.sum(attns * keys, axis=1)                                          # [B, H]

    # stage 2: output attention energies (lane-major [B, K], single store)
    q2 = jnp.dot(new_q, w2q, preferred_element_type=f32)                           # [B, H]
    t2 = jnp.tanh(kp2 + q2[:, None, :])                                            # [B, K, H]
    scores_ref[...] = jnp.sum(t2 * v2, axis=-1)                                    # [B, K]


def fused_strategy_step(box_flat, pre_box, hm_flat, h_prev, wblob, bblob, *, K):
    B, H = h_prev.shape
    return pl.pallas_call(
        _strategy_attention_kernel,
        out_shape=(jax.ShapeDtypeStruct((B, K), jnp.float32),
                   jax.ShapeDtypeStruct((B, H), jnp.float32)),
    )(box_flat, pre_box, hm_flat, h_prev, wblob, bblob)


# ---------------------------------------------------------------------------
# Parameter init (deterministic). All kernel-layout packing is done ONCE here.
# ---------------------------------------------------------------------------
def _xavier(key, shape, fan_in, fan_out):
    limit = (6.0 / (fan_in + fan_out)) ** 0.5
    return jax.random.uniform(key, shape, jnp.float32, -limit, limit)


def _pad_rows(m, rows):
    out = jnp.zeros((rows, m.shape[1]), jnp.float32)
    return out.at[:m.shape[0], :].set(m)


def init_params(key, box_dim, hidden_dim, hm_w, hm_l):
    H = hidden_dim
    half = H // 2
    hm_in = 2 * hm_w * hm_l
    ks = jax.random.split(key, 11)
    p = {}
    # TODO(synk): ObjectEncoder not provided -> per-box linear box_dim -> H.
    p["obj_w"] = _xavier(ks[0], (box_dim, H), box_dim, H)
    p["obj_b"] = jnp.zeros((H,), jnp.float32)
    # TODO(synk): HeightmapEncoder not provided -> flatten + linear 2*W*L -> H/2.
    p["hm_w"] = _xavier(ks[1], (hm_in, half), hm_in, half)
    p["hm_b"] = jnp.zeros((half,), jnp.float32)
    # prebox_encoder: Conv1d(3, H/2, kernel_size=1) on a length-1 sequence == linear.
    p["prebox_w"] = _xavier(ks[2], (box_dim, half), box_dim, half)
    p["prebox_b"] = jnp.zeros((half,), jnp.float32)
    # GRU(hidden_dim, hidden_dim, 1) -- canonical PyTorch layout (gate order r,z,n).
    p["gru_wih"] = _xavier(ks[3], (3 * H, H), H, H)
    p["gru_whh"] = _xavier(ks[4], (3 * H, H), H, H)
    p["gru_bih"] = jax.random.uniform(ks[9], (3 * H,), jnp.float32, -0.1, 0.1)
    p["gru_bhh"] = jax.random.uniform(ks[10], (3 * H,), jnp.float32, -0.1, 0.1)
    # attention parameters -- canonical PyTorch layout.
    # (init-fidelity note: fan choices approximate torch.xavier_uniform_ on 3-D tensors)
    p["v1"] = _xavier(ks[5], (1, 1, H), 1, H)
    p["W1"] = _xavier(ks[6], (1, H, 2 * H), 2 * H, H)
    p["v2"] = _xavier(ks[7], (1, 1, H), 1, H)
    p["W2"] = _xavier(ks[8], (1, H, 2 * H), 2 * H, H)

    # ---- derived, kernel-layout packed parameters ----
    Wx = jnp.transpose(p["gru_wih"])                     # [H, 3H]  cols = r|z|n
    Wh = jnp.transpose(p["gru_whh"])                     # [H, 3H]
    gru_w = jnp.zeros((2 * H, 4 * H), jnp.float32)
    gru_w = gru_w.at[0:H, 0:2 * H].set(Wx[:, 0:2 * H])           # r,z from x
    gru_w = gru_w.at[H:2 * H, 0:2 * H].set(Wh[:, 0:2 * H])       # r,z from h
    gru_w = gru_w.at[0:H, 2 * H:3 * H].set(Wx[:, 2 * H:3 * H])   # gi_n
    gru_w = gru_w.at[H:2 * H, 3 * H:4 * H].set(Wh[:, 2 * H:3 * H])  # gh_n
    gru_b = jnp.concatenate([p["gru_bih"][0:2 * H] + p["gru_bhh"][0:2 * H],
                             p["gru_bih"][2 * H:], p["gru_bhh"][2 * H:]])  # [4H]

    wk = jnp.concatenate([jnp.transpose(p["W1"][0, :, :H]),
                          jnp.transpose(p["W2"][0, :, :H])], axis=1)       # [H, 2H]
    w1q = jnp.transpose(p["W1"][0, :, H:])                                 # [H, H]
    w2q = jnp.transpose(p["W2"][0, :, H:])                                 # [H, H]

    # weight blob: [R, 10H] = gru(4H) | wk(2H) | w1q(H) | w2q(H) | obj(H) | pre(H/2) | hm(H/2)
    R = max(2 * H, box_dim, hm_in)
    p["wblob"] = jnp.concatenate([
        _pad_rows(gru_w, R), _pad_rows(wk, R), _pad_rows(w1q, R), _pad_rows(w2q, R),
        _pad_rows(p["obj_w"], R), _pad_rows(p["prebox_w"], R), _pad_rows(p["hm_w"], R),
    ], axis=1)
    # bias blob: [1, 8H] = gru_b(4H) | obj_b(H) | pre_b(H/2) | hm_b(H/2) | v1(H) | v2(H)
    p["bblob"] = jnp.concatenate([
        gru_b, p["obj_b"], p["prebox_b"], p["hm_b"],
        p["v1"][0, 0], p["v2"][0, 0]]).reshape(1, -1)
    return p


# ---------------------------------------------------------------------------
# Full forward: everything runs in the single fused Pallas kernel.
# ---------------------------------------------------------------------------
def strategy_attention_forward(params, box, precedences, pre_box, heightmap, last_hh):
    del precedences  # consumed only by the (unprovided) ObjectEncoder
    B, K, BD = box.shape
    box_flat = box.reshape(B * K, BD)          # free reshapes in the wrapper
    hm_flat = heightmap.reshape(B, -1)
    h_prev = last_hh[0]

    scores, h_new = fused_strategy_step(box_flat, pre_box, hm_flat, h_prev,
                                        params["wblob"], params["bblob"], K=K)

    attn_vecs = scores[:, None, :]             # [B, 1, K]  (free expand_dims)
    new_last_hh = h_new[None, :, :]            # [1, B, H]
    return attn_vecs, new_last_hh


# ---------------------------------------------------------------------------
# Pure-JAX reference (same math, unfused) for a correctness sanity check.
# ---------------------------------------------------------------------------
def reference_forward(p, box, precedences, pre_box, heightmap, last_hh):
    del precedences
    B, K, _ = box.shape
    H = p["gru_wih"].shape[1]
    keys = jnp.einsum("bkd,dh->bkh", box, p["obj_w"]) + p["obj_b"]
    pre_vec = pre_box @ p["prebox_w"] + p["prebox_b"]
    hm_vec = heightmap.reshape(B, -1) @ p["hm_w"] + p["hm_b"]
    x = jnp.concatenate([pre_vec, hm_vec], axis=1)
    h = last_hh[0]
    gi = x @ p["gru_wih"].T + p["gru_bih"]
    gh = h @ p["gru_whh"].T + p["gru_bhh"]
    r = jax.nn.sigmoid(gi[:, :H] + gh[:, :H])
    z = jax.nn.sigmoid(gi[:, H:2 * H] + gh[:, H:2 * H])
    n = jnp.tanh(gi[:, 2 * H:] + r * gh[:, 2 * H:])
    h_new = (1.0 - z) * n + z * h
    W1, W2 = p["W1"][0], p["W2"][0]
    v1, v2 = p["v1"][0, 0], p["v2"][0, 0]
    hid1 = jnp.concatenate([keys, jnp.broadcast_to(h_new[:, None, :], keys.shape)], axis=2)
    s1 = jnp.einsum("h,bkh->bk", v1, jnp.tanh(jnp.einsum("hj,bkj->bkh", W1, hid1)))
    attns = jax.nn.softmax(s1, axis=-1)
    new_q = jnp.einsum("bk,bkh->bh", attns, keys)
    hid2 = jnp.concatenate([keys, jnp.broadcast_to(new_q[:, None, :], keys.shape)], axis=2)
    s2 = jnp.einsum("h,bkh->bk", v2, jnp.tanh(jnp.einsum("hj,bkj->bkh", W2, hid2)))
    return s2[:, None, :], h_new[None, :, :]


if __name__ == "__main__":
    B, K, BOX_DIM, H = 2, 8, 3, 32
    HM_W, HM_L = 4, 4

    root = jax.random.PRNGKey(0)
    k_box, k_prec, k_pre, k_hm, k_hh, k_par = jax.random.split(root, 6)

    params = init_params(k_par, BOX_DIM, H, HM_W, HM_L)
    box = jax.random.normal(k_box, (B, K, BOX_DIM), jnp.float32)
    precedences = jax.random.normal(k_prec, (B, K, K), jnp.float32)
    pre_box = jax.random.normal(k_pre, (B, BOX_DIM), jnp.float32)
    heightmap = jax.random.normal(k_hm, (B, 2, HM_W, HM_L), jnp.float32)
    last_hh = jax.random.normal(k_hh, (1, B, H), jnp.float32)

    fwd = jax.jit(strategy_attention_forward)
    attn_vecs, new_hh = fwd(params, box, precedences, pre_box, heightmap, last_hh)
    jax.block_until_ready((attn_vecs, new_hh))

    assert attn_vecs.shape == (B, 1, K), attn_vecs.shape
    assert new_hh.shape == (1, B, H), new_hh.shape
    assert bool(jnp.all(jnp.isfinite(attn_vecs))) and bool(jnp.all(jnp.isfinite(new_hh)))

    ref_scores, ref_hh = reference_forward(params, box, precedences, pre_box, heightmap, last_hh)
    assert bool(jnp.allclose(attn_vecs, ref_scores, atol=5e-2, rtol=5e-2)), "scores mismatch"
    assert bool(jnp.allclose(new_hh, ref_hh, atol=5e-2, rtol=5e-2)), "hidden mismatch"

    print("KERNEL_OK")
</pallas_src>

<mosaic_0001>
module attributes {stable_mosaic.version = 11 : i64} {
  func.func @_strategy_attention_kernel(%arg0: memref<16x3xf32, #tpu.memory_space<vmem>>, %arg1: memref<2x3xf32, #tpu.memory_space<vmem>>, %arg2: memref<2x32xf32, #tpu.memory_space<vmem>>, %arg3: memref<2x32xf32, #tpu.memory_space<vmem>>, %arg4: memref<64x320xf32, #tpu.memory_space<vmem>>, %arg5: memref<1x256xf32, #tpu.memory_space<vmem>>, %arg6: memref<2x8xf32, #tpu.memory_space<vmem>>, %arg7: memref<2x32xf32, #tpu.memory_space<vmem>>) attributes {dimension_semantics = [], scalar_prefetch = 0 : i64, scratch_operands = 0 : i64, tpu.core_type = #tpu.core_type<tc>} {
    %c0 = arith.constant 0 : index
    %c0_0 = arith.constant 0 : index
    %0 = vector.load %arg4[%c0, %c0_0] : memref<64x320xf32, #tpu.memory_space<vmem>>, vector<64x128xf32>
    %c0_1 = arith.constant 0 : index
    %c128 = arith.constant 128 : index
    %1 = vector.load %arg4[%c0_1, %c128] : memref<64x320xf32, #tpu.memory_space<vmem>>, vector<32x64xf32>
    %c0_2 = arith.constant 0 : index
    %c192 = arith.constant 192 : index
    %2 = vector.load %arg4[%c0_2, %c192] : memref<64x320xf32, #tpu.memory_space<vmem>>, vector<32x32xf32>
    %c0_3 = arith.constant 0 : index
    %c224 = arith.constant 224 : index
    %3 = vector.load %arg4[%c0_3, %c224] : memref<64x320xf32, #tpu.memory_space<vmem>>, vector<32x32xf32>
    %c0_4 = arith.constant 0 : index
    %c256 = arith.constant 256 : index
    %4 = vector.load %arg4[%c0_4, %c256] : memref<64x320xf32, #tpu.memory_space<vmem>>, vector<3x32xf32>
    %c0_5 = arith.constant 0 : index
    %c288 = arith.constant 288 : index
    %5 = vector.load %arg4[%c0_5, %c288] : memref<64x320xf32, #tpu.memory_space<vmem>>, vector<3x16xf32>
    %c0_6 = arith.constant 0 : index
    %c304 = arith.constant 304 : index
    %6 = vector.load %arg4[%c0_6, %c304] : memref<64x320xf32, #tpu.memory_space<vmem>>, vector<32x16xf32>
    %c0_7 = arith.constant 0 : index
    %c0_8 = arith.constant 0 : index
    %7 = vector.load %arg5[%c0_7, %c0_8] : memref<1x256xf32, #tpu.memory_space<vmem>>, vector<1x128xf32>
    %c0_9 = arith.constant 0 : index
    %c128_10 = arith.constant 128 : index
    %8 = vector.load %arg5[%c0_9, %c128_10] : memref<1x256xf32, #tpu.memory_space<vmem>>, vector<1x32xf32>
    %c0_11 = arith.constant 0 : index
    %c160 = arith.constant 160 : index
    %9 = vector.load %arg5[%c0_11, %c160] : memref<1x256xf32, #tpu.memory_space<vmem>>, vector<1x16xf32>
    %c0_12 = arith.constant 0 : index
    %c176 = arith.constant 176 : index
    %10 = vector.load %arg5[%c0_12, %c176] : memref<1x256xf32, #tpu.memory_space<vmem>>, vector<1x16xf32>
    %c0_13 = arith.constant 0 : index
    %c192_14 = arith.constant 192 : index
    %11 = vector.load %arg5[%c0_13, %c192_14] : memref<1x256xf32, #tpu.memory_space<vmem>>, vector<1x32xf32>
    %c0_15 = arith.constant 0 : index
    %c224_16 = arith.constant 224 : index
    %12 = vector.load %arg5[%c0_15, %c224_16] : memref<1x256xf32, #tpu.memory_space<vmem>>, vector<1x32xf32>
    %c0_17 = arith.constant 0 : index
    %c0_18 = arith.constant 0 : index
    %13 = vector.load %arg0[%c0_17, %c0_18] : memref<16x3xf32, #tpu.memory_space<vmem>>, vector<16x3xf32>
    %cst = arith.constant dense<0.000000e+00> : vector<16x32xf32>
    %14 = tpu.matmul %13, %4, %cst {dimension_numbers = #tpu.dot_dimension_numbers<[1], [0], [0], [1], [0, 0, 1, 1], [], []>} : vector<16x3xf32>, vector<3x32xf32>, vector<16x32xf32> -> vector<16x32xf32>
    %15 = vector.broadcast %8 : vector<1x32xf32> to vector<16x32xf32>
    %16 = arith.addf %14, %15 : vector<16x32xf32>
    %17 = vector.shape_cast %16 : vector<16x32xf32> to vector<2x8x32xf32>
    %c0_19 = arith.constant 0 : index
    %c0_20 = arith.constant 0 : index
    %18 = vector.load %arg1[%c0_19, %c0_20] : memref<2x3xf32, #tpu.memory_space<vmem>>, vector<2x3xf32>
    %cst_21 = arith.constant dense<0.000000e+00> : vector<2x16xf32>
    %19 = tpu.matmul %18, %5, %cst_21 {dimension_numbers = #tpu.dot_dimension_numbers<[1], [0], [0], [1], [0, 0, 1, 1], [], []>} : vector<2x3xf32>, vector<3x16xf32>, vector<2x16xf32> -> vector<2x16xf32>
    %20 = vector.broadcast %9 : vector<1x16xf32> to vector<2x16xf32>
    %21 = arith.addf %19, %20 : vector<2x16xf32>
    %c0_22 = arith.constant 0 : index
    %c0_23 = arith.constant 0 : index
    %22 = vector.load %arg2[%c0_22, %c0_23] : memref<2x32xf32, #tpu.memory_space<vmem>>, vector<2x32xf32>
    %cst_24 = arith.constant dense<0.000000e+00> : vector<2x16xf32>
    %23 = tpu.matmul %22, %6, %cst_24 {dimension_numbers = #tpu.dot_dimension_numbers<[1], [0], [0], [1], [0, 0, 1, 1], [], []>} : vector<2x32xf32>, vector<32x16xf32>, vector<2x16xf32> -> vector<2x16xf32>
    %24 = vector.broadcast %10 : vector<1x16xf32> to vector<2x16xf32>
    %25 = arith.addf %23, %24 : vector<2x16xf32>
    %26 = tpu.concatenate %21, %25 in 1 : vector<2x16xf32>, vector<2x16xf32> -> vector<2x32xf32>
    %c0_25 = arith.constant 0 : index
    %c0_26 = arith.constant 0 : index
    %27 = vector.load %arg3[%c0_25, %c0_26] : memref<2x32xf32, #tpu.memory_space<vmem>>, vector<2x32xf32>
    %28 = tpu.concatenate %26, %27 in 1 : vector<2x32xf32>, vector<2x32xf32> -> vector<2x64xf32>
    %cst_27 = arith.constant dense<0.000000e+00> : vector<2x128xf32>
    %29 = tpu.matmul %28, %0, %cst_27 {dimension_numbers = #tpu.dot_dimension_numbers<[1], [0], [0], [1], [0, 0, 1, 1], [], []>} : vector<2x64xf32>, vector<64x128xf32>, vector<2x128xf32> -> vector<2x128xf32>
    %30 = vector.broadcast %7 : vector<1x128xf32> to vector<2x128xf32>
    %31 = arith.addf %29, %30 : vector<2x128xf32>
    %32 = vector.extract_strided_slice %31 {offsets = [0, 0], sizes = [2, 32], strides = [1, 1]} : vector<2x128xf32> to vector<2x32xf32>
    %33 = arith.negf %32 : vector<2x32xf32>
    %34 = math.exp %33 : vector<2x32xf32>
    %cst_28 = arith.constant 1.000000e+00 : f32
    %35 = vector.broadcast %cst_28 : f32 to vector<2x32xf32>
    %36 = arith.addf %35, %34 : vector<2x32xf32>
    %37 = arith.divf %35, %36 : vector<2x32xf32>
    %38 = vector.extract_strided_slice %31 {offsets = [0, 32], sizes = [2, 32], strides = [1, 1]} : vector<2x128xf32> to vector<2x32xf32>
    %39 = arith.negf %38 : vector<2x32xf32>
    %40 = math.exp %39 : vector<2x32xf32>
    %cst_29 = arith.constant 1.000000e+00 : f32
    %41 = vector.broadcast %cst_29 : f32 to vector<2x32xf32>
    %42 = arith.addf %41, %40 : vector<2x32xf32>
    %43 = arith.divf %41, %42 : vector<2x32xf32>
    %44 = vector.extract_strided_slice %31 {offsets = [0, 64], sizes = [2, 32], strides = [1, 1]} : vector<2x128xf32> to vector<2x32xf32>
    %45 = vector.extract_strided_slice %31 {offsets = [0, 96], sizes = [2, 32], strides = [1, 1]} : vector<2x128xf32> to vector<2x32xf32>
    %46 = arith.mulf %37, %45 : vector<2x32xf32>
    %47 = arith.addf %44, %46 : vector<2x32xf32>
    %48 = math.tanh %47 : vector<2x32xf32>
    %cst_30 = arith.constant 1.000000e+00 : f32
    %49 = vector.broadcast %cst_30 : f32 to vector<2x32xf32>
    %50 = arith.subf %49, %43 : vector<2x32xf32>
    %51 = arith.mulf %50, %48 : vector<2x32xf32>
    %52 = arith.mulf %43, %27 : vector<2x32xf32>
    %53 = arith.addf %51, %52 : vector<2x32xf32>
    %c0_31 = arith.constant 0 : index
    %c0_32 = arith.constant 0 : index
    %54 = vector.load %arg7[%c0_31, %c0_32] : memref<2x32xf32, #tpu.memory_space<vmem>>, vector<2x32xf32>
    tpu.vector_store %arg7[%c0_31, %c0_32], %53 {strides = array<i32>} : memref<2x32xf32, #tpu.memory_space<vmem>>, vector<2x32xf32>,
    %cst_33 = arith.constant dense<0.000000e+00> : vector<16x64xf32>
    %55 = tpu.matmul %16, %1, %cst_33 {dimension_numbers = #tpu.dot_dimension_numbers<[1], [0], [0], [1], [0, 0, 1, 1], [], []>} : vector<16x32xf32>, vector<32x64xf32>, vector<16x64xf32> -> vector<16x64xf32>
    %56 = vector.extract_strided_slice %55 {offsets = [0, 0], sizes = [16, 32], strides = [1, 1]} : vector<16x64xf32> to vector<16x32xf32>
    %57 = vector.shape_cast %56 : vector<16x32xf32> to vector<2x8x32xf32>
    %58 = vector.extract_strided_slice %55 {offsets = [0, 32], sizes = [16, 32], strides = [1, 1]} : vector<16x64xf32> to vector<16x32xf32>
    %59 = vector.shape_cast %58 : vector<16x32xf32> to vector<2x8x32xf32>
    %cst_34 = arith.constant dense<0.000000e+00> : vector<2x32xf32>
    %60 = tpu.matmul %53, %2, %cst_34 {dimension_numbers = #tpu.dot_dimension_numbers<[1], [0], [0], [1], [0, 0, 1, 1], [], []>} : vector<2x32xf32>, vector<32x32xf32>, vector<2x32xf32> -> vector<2x32xf32>
    %61 = vector.shape_cast %60 : vector<2x32xf32> to vector<2x1x32xf32>
    %62 = vector.broadcast %61 : vector<2x1x32xf32> to vector<2x8x32xf32>
    %63 = arith.addf %57, %62 : vector<2x8x32xf32>
    %64 = math.tanh %63 : vector<2x8x32xf32>
    %65 = vector.shape_cast %11 : vector<1x32xf32> to vector<1x1x32xf32>
    %66 = vector.broadcast %65 : vector<1x1x32xf32> to vector<2x8x32xf32>
    %67 = arith.mulf %64, %66 : vector<2x8x32xf32>
    %cst_35 = arith.constant dense<0.000000e+00> : vector<2x8xf32>
    %68 = vector.multi_reduction <add>, %67, %cst_35 [2] : vector<2x8x32xf32> to vector<2x8xf32>
    %69 = vector.shape_cast %68 : vector<2x8xf32> to vector<2x8x1xf32>
    %cst_36 = arith.constant dense<0xFF800000> : vector<2x1xf32>
    %70 = vector.multi_reduction <maximumf>, %69, %cst_36 [1] : vector<2x8x1xf32> to vector<2x1xf32>
    %71 = vector.shape_cast %70 : vector<2x1xf32> to vector<2x1x1xf32>
    %72 = vector.broadcast %71 : vector<2x1x1xf32> to vector<2x8x1xf32>
    %73 = arith.subf %69, %72 : vector<2x8x1xf32>
    %74 = math.exp %73 : vector<2x8x1xf32>
    %cst_37 = arith.constant dense<0.000000e+00> : vector<2x1xf32>
    %75 = vector.multi_reduction <add>, %74, %cst_37 [1] : vector<2x8x1xf32> to vector<2x1xf32>
    %76 = vector.shape_cast %75 : vector<2x1xf32> to vector<2x1x1xf32>
    %77 = tpu.reciprocal %76 {approx = true} : vector<2x1x1xf32> -> vector<2x1x1xf32>
    %78 = vector.broadcast %77 : vector<2x1x1xf32> to vector<2x8x1xf32>
    %79 = arith.mulf %74, %78 : vector<2x8x1xf32>
    %80 = vector.broadcast %79 : vector<2x8x1xf32> to vector<2x8x32xf32>
    %81 = arith.mulf %80, %17 : vector<2x8x32xf32>
    %cst_38 = arith.constant dense<0.000000e+00> : vector<2x32xf32>
    %82 = vector.multi_reduction <add>, %81, %cst_38 [1] : vector<2x8x32xf32> to vector<2x32xf32>
    %cst_39 = arith.constant dense<0.000000e+00> : vector<2x32xf32>
    %83 = tpu.matmul %82, %3, %cst_39 {dimension_numbers = #tpu.dot_dimension_numbers<[1], [0], [0], [1], [0, 0, 1, 1], [], []>} : vector<2x32xf32>, vector<32x32xf32>, vector<2x32xf32> -> vector<2x32xf32>
    %84 = vector.shape_cast %83 : vector<2x32xf32> to vector<2x1x32xf32>
    %85 = vector.broadcast %84 : vector<2x1x32xf32> to vector<2x8x32xf32>
    %86 = arith.addf %59, %85 : vector<2x8x32xf32>
    %87 = math.tanh %86 : vector<2x8x32xf32>
    %88 = vector.shape_cast %12 : vector<1x32xf32> to vector<1x1x32xf32>
    %89 = vector.broadcast %88 : vector<1x1x32xf32> to vector<2x8x32xf32>
    %90 = arith.mulf %87, %89 : vector<2x8x32xf32>
    %cst_40 = arith.constant dense<0.000000e+00> : vector<2x8xf32>
    %91 = vector.multi_reduction <add>, %90, %cst_40 [2] : vector<2x8x32xf32> to vector<2x8xf32>
    %c0_41 = arith.constant 0 : index
    %c0_42 = arith.constant 0 : index
    %92 = vector.load %arg6[%c0_41, %c0_42] : memref<2x8xf32, #tpu.memory_space<vmem>>, vector<2x8xf32>
    tpu.vector_store %arg6[%c0_41, %c0_42], %91 {strides = array<i32>} : memref<2x8xf32, #tpu.memory_space<vmem>>, vector<2x8xf32>,
    return
  }
}

</mosaic_0001>

<bundles_post_ra>
// kernel: strategy_attention_forward.1
= control target key start
LH: loop header
LB: loop body
LE: loop exit
PB: predicated region body
PF: predicated region fallthrough
CT: control target
= control target key end

     0   :  { %13 = vsyncpa [#allocation3], 0  ;;  %s1437_s0 = inlined_call_operand.vmem [shape: f32[16,3], index: 0, kind: input, shape index: {}]   ;;  %s1438_s1 = inlined_call_operand.vmem [shape: f32[2,3], index: 1, kind: input, shape index: {}]   ;;  %s1439_s2 = inlined_call_operand.vmem [shape: f32[2,32], index: 2, kind: input, shape index: {}]   ;;  %s1440_s3 = inlined_call_operand.vmem [shape: f32[2,32], index: 3, kind: input, shape index: {}]   ;;  %s1441_s4 = inlined_call_operand.hbm [shape: f32[64,320], index: 4, kind: input, shape index: {}]   ;;  %s1442_s5 = inlined_call_operand.vmem [shape: f32[1,256], index: 5, kind: input, shape index: {}]   ;;  %s1443_s6 = inlined_call_operand.hbm [shape: f32[2,8], index: 6, kind: output, shape index: {0}]   ;;  %s1444_s7 = inlined_call_operand.hbm [shape: f32[2,32], index: 7, kind: output, shape index: {1}]  }
   0x1   :  { %14 = vsyncpa [#allocation4], 0 }
   0x2   :  { %15 = vsyncpa [#allocation7], 0  ;;  %s1207_s24 = smov [#allocation2]   ;;  %s1135_s28 = scalar_lea.hbm %s1441_s4, 3072 }
   0x3   :  { %s29_s25 = sshll.u32 %s1207_s24, 4  ;;  %p1136_p0 = scmp.ne.s32.totalorder %s1441_s4, %s1135_s28  ;;  %s30_s25 = int_to_ptr.vmem [resolvable:$true] %s29_s25 }
   0x4   :  { %p1139_p1 = scmp.lt.u32.totalorder %s1135_s28, %s1441_s4 }
   0x6   :  { %p1141_p2 = pnand %p1139_p1, %p1136_p0 }
   0x8   :  { %1144 = shalt.err (!%p1141_p2)
}
   0x9   :  { %s1145_s10 = scalar_lea.vmem %s30_s25, 3072  ;;  %p1150_p4 = scmp.lt.s32.totalorder %s30_s25, %s30_s25 }
   0xa   :  { %p1146_p3 = scmp.ne.s32.totalorder %s30_s25, %s1145_s10  ;;  %p1151_p5 = scmp.lt.s32.totalorder %s1145_s10, %s1145_s10 }
   0xc   :  { %p1152_p6 = por %p1151_p5, %p1150_p4 }
   0xe   :  { %p1153_p7 = pnand %p1152_p6, %p1146_p3 }
  0x10   :  { %1156 = shalt.err (!%p1153_p7)
}
  0x11   :  { %s1208_s11 = smov 384   ;;  %s1209_s12 = smov 24  }
  0x12   :  { %35 = dma.hbm_to_vmem [thread:$0]  %s1441_s4, 3072, %s30_s25, [#allocation3], %s1208_s11, %s1208_s11, %s1209_s12  }
  0x13   :  { %1201 = dma.done.wait [#allocation3], 3072  }
  0x14   :  { %1202 = vsyncadd [#allocation3], 4294964224  ;;  %vm75_vm0 = vcmask 1042432   ;;  %vm68_vm1 = vcmask 23552   ;;  %v1210_v0 = vmov 0.0   ;;  %vm1211_vm2 = vmmov 0  }
  0x15   :  { %963 = vmatprep.subr.mxu1 %v1210_v0  ;;  %965 = vmatprep.mubr.msk.f32.mxu1 %vm1211_vm2, %v1210_v0  ;;  %v54_v1 = vld [vmem:[#allocation2 + $0x10] sm:$0xff]  ;;  %v55_v2 = vld [vmem:[#allocation2 + $0x28] sm:$0xff]  ;;  %v56_v3 = vld [vmem:[#allocation2 + $0x40] sm:$0xff]  ;;  %s1212_s18 = smov 80   ;;  %v1213_v10 = vmov 0.0|0.0   ;;  %s1214_s19 = smov 96  }
  0x16   :  { %v1083_v4 = vpack.i.bf16 %v55_v2, %v54_v1  ;;  %v57_v5 = vld [vmem:[#allocation2 + $0x58] sm:$0xff]  ;;  %v53_v6 = vld [vmem:[#allocation2 + $0x10] sm:$0x7]  ;;  %v60_v7 = vld [vmem:[%s1437_s0] sm:$0xff]  ;;  %vm255_vm3 = vcmask 261120   ;;  %vm333_vm4 = vcmask 130048  }
  0x17   :  { %958 = vmatprep.subr.msk.mxu0 %vm75_vm0, %v53_v6  ;;  %960 = vmatprep.mubr.msk.f32.mxu0 %vm68_vm1, %v60_v7  ;;  %v61_v8 = vld [vmem:[%s1437_s0 + $0x8] sm:$0xff]  ;;  %v1088_v9 = vpack.i.bf16 %v57_v5, %v56_v3  ;;  %v1293_v11 = vld [vmem:[%s1442_s5 + $0x1] ss:$0 sm:$0xff]  ;;  %v1313_v25 = vld [vmem:[#allocation2 + $0x38] sm:$0xff]  ;;  %vm347_vm5 = vcmask 523264   ;;  %s1217_s28 = smov 64  }
  0x18   :  { %1084 = vrot.lane.b32.xlu0 %v1083_v4, %s1212_s18  ;;  %959 = vmatpush3.msk.msra.mxu0 %vm75_vm0, %v53_v6  ;;  %v154_v15 = vld [vmem:[%s1438_s1] sm:$0x3]  ;;  %v1302_v18 = vld [vmem:[#allocation2 + $0x8] sm:$0xff]  ;;  %v1315_v26 = vld [vmem:[#allocation2 + $0x50] sm:$0xff]  ;;  %vm450_vm6 = vcmask 254976   ;;  %vm721_vm7 = vcmask 1041409  }
  0x19   :  { %961 = vmatmul.mubr.msk.f32.vlgmr.msra.gmra.mrb[0].mxu0 %vm68_vm1, %v61_v8  ;;  %1031 = vmatprep.subr.bf16.mxu0 %v1213_v10  ;;  %v1304_v19 = vld [vmem:[#allocation2 + $0x20] sm:$0xff]  ;;  %v1053_v28 = vpack.c.bf16 %v1315_v26, %v1313_v25  ;;  %v42_v32 = vld [vmem:[#allocation2 + $0x18] sm:$0xff]  ;;  %v43_v36 = vld [vmem:[#allocation2 + $0x30] sm:$0xff] }
  0x1a   :  { %155 = vrot.lane.b32.xlu1 %v53_v6, %s1214_s19  ;;  %976 = vmatprep.mubr.msk.f32.mxu0 %vm1211_vm2, %v1210_v0  ;;  %v1049_v23 = vpack.c.bf16 %v1304_v19, %v1302_v18  ;;  %v235_v27 = vld [vmem:[%s1439_s2] sm:$0x3]  ;;  %s1215_s2 = smov 32   ;;  %v44_v37 = vld [vmem:[#allocation2 + $0x48] sm:$0xff]  ;;  %v46_v41 = vld [vmem:[#allocation2 + $0x78] sm:$0xff] }
  0x1b   :  { %v335_v30 = vld [vmem:[%s1440_s3] sm:$0x3]  ;;  %v1041_v39 = vpack.c.bf16 %v44_v37, %v43_v36  ;;  %v47_v43 = vld [vmem:[#allocation2 + $0x90] sm:$0xff]  ;;  %v48_v44 = vld [vmem:[#allocation2 + $0xa8] sm:$0xff]  ;;  %s1216_s3 = smov 16  }
  0x1c   :  { %1089 = vrot.lane.b32.xlu0 %v1088_v9, %s1212_s18  ;;  %v41_v31 = vld [vmem:[#allocation2] sm:$0xff]  ;;  %v1047_v45 = vpack.c.bf16 %v48_v44, %v47_v43 }
  0x1d   :  { %v1038_v35 = vpack.c.bf16 %v42_v32, %v41_v31  ;;  %v45_v40 = vld [vmem:[#allocation2 + $0x60] sm:$0xff] }
  0x1e   :  { %252 = vrot.lane.b32.xlu1 %v1293_v11, %s1212_s18  ;;  %v1044_v42 = vpack.c.bf16 %v46_v41, %v45_v40  ;;  %v916_v60 = vld [vmem:[%s1442_s5] ss:$0 sm:$0xff]  ;;  %s1219_s5 = smov [#allocation6]  }
  0x1f   :  { %s896_s29 = sshll.u32 %s1219_s5, 4  ;;  %s897_s29 = int_to_ptr.vmem [resolvable:$true] %s896_s29 }
  0x20   :  { %157 = vrot.lane.b32.xlu0 %v1293_v11, %s1214_s19  ;;  %s1157_s30 = scalar_lea.vmem %s897_s29, 32  ;;  %p1162_p9 = scmp.lt.s32.totalorder %s897_s29, %s897_s29 }
  0x21   :  { %p1158_p8 = scmp.ne.s32.totalorder %s897_s29, %s1157_s30  ;;  %p1163_p10 = scmp.lt.s32.totalorder %s1157_s30, %s1157_s30 }
  0x23   :  { %p1164_p11 = por %p1163_p10, %p1162_p9 }
  0x24   :  { %337 = vrot.lane.b32.xlu0 %v335_v30, %s1215_s2 }
  0x25   :  { %p1165_p12 = pnand %p1164_p11, %p1158_p8 }
  0x8a   :  { %v1085_v12 = vpop.permute.xlu0 %1084 }
  0x8b   :  { %v1087_v13 = vunpack.i.h.bf16 %v1085_v12  ;;  %v1086_v14 = vunpack.i.l.bf16 %v1085_v12 }
  0x8c   :  { %v156_v16 = vpop.permute.xlu1 %155 }
  0x8d   :  { %v1032_v17 = vpack.c.bf16 %v1087_v13, %v1086_v14  ;;  %964 = vmatpush3.msk.msra.mxu1 %vm75_vm0, %v156_v16  ;;  %v1098_v16 = vpack.i.bf16 %v1315_v26, %v1313_v25  ;;  %v1218_v25 = vmov 1966171168  }
  0x8e   :  { %v1090_v20 = vpop.permute.xlu0 %1089  ;;  %966 = vmatmul.mubr.msk.f32.vlgmr.msra.gmra.mrb[0].mxu1 %vm68_vm1, %v154_v15  ;;  %1037 = vmatprep.subr.bf16.mxu1 %v1213_v10  ;;  %v623_v26 = vunpack.c.l.s4 %v1218_v25 }
  0x8f   :  { %v1092_v21 = vunpack.i.h.bf16 %v1090_v20  ;;  %v1091_v22 = vunpack.i.l.bf16 %v1090_v20  ;;  %1033 = vmatpush3.bf16.msra.mxu0 %v1032_v17  ;;  %995 = vmatprep.mubr.msk.f32.mxu1 %vm1211_vm2, %v1210_v0 }
  0x90   :  { %1034 = vmatprep.subr.bf16.mxu0 %v1213_v10  ;;  %1039 = vmatpush3.bf16.msra.mxu1 %v1038_v35  ;;  %v253_v48 = vpop.permute.xlu1 %252 }
  0x91   :  { %v1035_v24 = vpack.c.bf16 %v1092_v21, %v1091_v22  ;;  %1040 = vmatprep.subr.bf16.mxu1 %v1213_v10 }
  0x92   :  { %v158_v54 = vpop.permute.xlu0 %157 }
  0x93   :  { %1036 = vmatpush3.bf16.msra.mxu0 %v1035_v24 }
  0x94   :  { %1050 = vmatprep.subr.bf16.mxu0 %v1049_v23  ;;  %1042 = vmatpush3.bf16.msra.mxu1 %v1041_v39 }
  0x95   :  { %1043 = vmatprep.subr.bf16.mxu1 %v1213_v10 }
  0x96   :  { %977 = vmatmul.mubr.msk.f32.vlgmr.msra.gmra.mrb[2].mxu0 %vm255_vm3, %v235_v27  ;;  %v338_v56 = vpop.permute.xlu0 %337 }
  0x97   :  { %1052 = vmatpush3.bf16.msra.mxu0 %v1049_v23 }
  0x98   :  { %1054 = vmatprep.subr.bf16.mxu0 %v1053_v28  ;;  %1045 = vmatpush3.bf16.msra.mxu1 %v1044_v42 }
  0x99   :  { %1046 = vmatprep.subr.bf16.mxu1 %v1213_v10 }
  0x9b   :  { %1056 = vmatpush3.bf16.msra.mxu0 %v1053_v28 }
  0x9c   :  { %1057 = vmatprep.subr.bf16.mxu0 %v1213_v10  ;;  %1048 = vmatpush3.bf16.msra.mxu1 %v1047_v45 }
  0x9d   :  { %1063 = vmatprep.subr.bf16.mxu1 %v1213_v10 }
  0xec   :  { %v962_v29 = vpop.f32.mrb[0].mxu0 }
  0xed   :  { %v1328_v33 = vadd.f32 %v962_v29, %v1293_v11  ;;  %v145_v34 = vpop.f32.mrb[1].mxu0  ;;  %v624_v29 = vunpack.c.0.s8 %v623_v26 }
  0xee   :  { %v1332_v38 = vadd.f32 %v1293_v11, %v145_v34 }
  0xf0   :  { %1006 = vmatprep.mubr.msk.f32.mxu0 %vm255_vm3, %v1332_v38 }
  0xf1   :  { %1007 = vmatmul.mubr.msk.f32.vlgmr.msra.gmra.mrb[4].mxu0 %vm255_vm3, %v1328_v33 }
  0xf2   :  { %1017 = vmatprep.mubr.msk.f32.mxu0 %vm1211_vm2, %v1210_v0 }
 0x161   :  { %v231_v46 = vpop.f32.mrb[0].mxu1 }
 0x162   :  { %v967_v47 = vpop.f32.mrb[1].mxu1  ;;  %v232_v55 = vadd.f32 %v231_v46, %v158_v54 }
 0x169   :  { %v325_v49 = vpop.f32.mrb[2].mxu0 }
 0x16a   :  { %v326_v50 = vadd.f32 %v325_v49, %v253_v48  ;;  %v978_v51 = vpop.f32.mrb[3].mxu0 }
 0x16c   :  { %330 = vrot.lane.b32.xlu1 %v326_v50, %s1216_s3 }
 0x1c4   :  { %v1344_v52 = vpop.f32.mrb[4].mxu0 }
 0x1c5   :  { %v1346_v53 = vpop.f32.mrb[5].mxu0 }
 0x1de   :  { %v331_v57 = vpop.permute.xlu1 %330 }
 0x1df   :  { %v334_v58 = vsel %vm333_vm4, %v232_v55, %v331_v57 }
 0x1e0   :  { %v340_v59 = vsel %vm255_vm3, %v334_v58, %v338_v56 }
 0x1e1   :  { %996 = vmatmul.mubr.msk.f32.vlgmr.msra.gmra.mrb[2].mxu1 %vm347_vm5, %v340_v59 }
 0x1e2   :  { %1028 = vmatprep.mubr.msk.f32.mxu1 %vm1211_vm2, %v1210_v0  ;;  %v1093_v0 = vpack.i.bf16 %v1304_v19, %v1302_v18 }
 0x2b4   :  { %v417_v61 = vpop.f32.mrb[2].mxu1 }
 0x2b5   :  { %v418_v62 = vadd.f32 %v916_v60, %v417_v61  ;;  %v997_v63 = vpop.f32.mrb[3].mxu1 }
 0x2b7   :  { %428 = vrot.lane.b32.xlu1 %v418_v62, %s1215_s2  ;;  %v918_v1 = vmul.f32 -1.442695, %v418_v62 }
 0x2b9   :  { %1113 = vpow2.f32 %v918_v1 }
 0x2c3   :  { %v1114_v2 = vpop.eup %1113 }
 0x2c4   :  { %v424_v3 = vadd.f32 1.0, %v1114_v2 }
 0x2c6   :  { %1115 = vrcp.f32 %v424_v3 }
 0x2d0   :  { %v1116_v4 = vpop.eup %1115 }
 0x2d1   :  { %v438_v17 = vsub.f32 1.0, %v1116_v4  ;;  %v444_v19 = vmul.f32 %v1116_v4, %v338_v56 }
 0x329   :  { %v429_v5 = vpop.permute.xlu1 %428 }
 0x32a   :  { %v431_v6 = vmul.f32 %v1116_v4, %v429_v5 }
 0x32c   :  { %433 = vrot.lane.b32.xlu0 %v431_v6, %s1217_s28 }
 0x330   :  { %1094 = vrot.lane.b32.xlu0 %v1093_v0, %s1217_s28 }
 0x39e   :  { %v434_v7 = vpop.permute.xlu0 %433 }
 0x39f   :  { %v436_v8 = vadd.f32 %v434_v7, %v418_v62 }
 0x3a1   :  { %1117 = vtanh.f32 %v436_v8 }
 0x3a2   :  { %v1095_v9 = vpop.permute.xlu0 %1094 }
 0x3a3   :  { %v1097_v12 = vunpack.i.h.bf16 %v1095_v9  ;;  %v1096_v13 = vunpack.i.l.bf16 %v1095_v9 }
 0x3a5   :  { %v1058_v14 = vpack.c.bf16 %v1097_v12, %v1096_v13 }
 0x3a7   :  { %1059 = vmatpush3.bf16.msra.mxu0 %v1058_v14 }
 0x3a8   :  { %1060 = vmatprep.subr.bf16.mxu0 %v1213_v10 }
 0x3ab   :  { %v1118_v15 = vpop.eup %1117 }
 0x3ac   :  { %440 = vrot.lane.b32.xlu1 %v1118_v15, %s1214_s19 }
 0x3b0   :  { %1099 = vrot.lane.b32.xlu1 %v1098_v16, %s1217_s28 }
 0x3b4   :  { %658 = vrot.lane.b32.xlu1 %v1293_v11, %s1217_s28  ;;  %v625_v11 = vlaneseq }
 0x3b6   :  { %v1365_v30 = vshrl.u32 %v625_v11, 7 }
 0x3b8   :  { %v1368_v31 = vsub.s32 %v624_v29, %v1365_v30  ;;  %v1372_v35 = vsub.s32 0, %v1365_v30 }
 0x41e   :  { %v441_v18 = vpop.permute.xlu1 %440 }
 0x41f   :  { %v443_v20 = vmul.f32 %v441_v18, %v438_v17 }
 0x421   :  { %v445_v21 = vadd.f32 %v444_v19, %v443_v20 }
 0x422   :  { %v1100_v22 = vpop.permute.xlu1 %1099 }
 0x423   :  { %447 = vrot.lane.b32.xlu0 %v445_v21, %s1214_s19  ;;  %v1102_v23 = vunpack.i.h.bf16 %v1100_v22  ;;  %v1101_v24 = vunpack.i.l.bf16 %v1100_v22 }
 0x425   :  { %v1061_v27 = vpack.c.bf16 %v1102_v23, %v1101_v24 }
 0x426   :  { %v1380_v45 = vpop.permute.xlu1 %658 }
 0x427   :  { %1062 = vmatpush3.bf16.msra.mxu0 %v1061_v27 }
 0x495   :  { %v448_v28 = vpop.permute.xlu0 %447 }
 0x496   :  { %1018 = vmatmul.mubr.msk.f32.vlgmr.msra.gmra.mrb[6].mxu0 %vm255_vm3, %v448_v28  ;;  %451 = vst.msk [vmem:[#allocation6] sm:$0x3] %vm450_vm6, %v448_v28 }
 0x569   :  { %v617_v32 = vpop.f32.mrb[6].mxu0 }
 0x56a   :  { %v628_v34 = vrot.slane %v617_v32, %v1368_v31  ;;  %v1019_v36 = vpop.f32.mrb[7].mxu0 }
 0x56c   :  { %v629_v37 = vcombine.high %v628_v34, %v628_v34  ;;  %v636_v39 = vrot.slane %v628_v34, %v1368_v31 }
 0x56e   :  { %v643_v40 = vrot.slane %v629_v37, %v1368_v31  ;;  %v647_v41 = vrot.slane %v636_v39, %v1372_v35 }
 0x570   :  { %v651_v42 = vrot.slane %v643_v40, %v1372_v35  ;;  %v654_v43 = vadd.f32 %v647_v41, %v1346_v53 }
 0x572   :  { %v655_v44 = vadd.f32 %v1344_v52, %v651_v42  ;;  %1119 = vtanh.f32 %v654_v43 }
 0x574   :  { %1121 = vtanh.f32 %v655_v44 }
 0x57c   :  { %v1120_v46 = vpop.eup %1119 }
 0x57d   :  { %v661_v47 = vmul.f32 %v1120_v46, %v1380_v45 }
 0x57e   :  { %v1122_v48 = vpop.eup %1121 }
 0x57f   :  { %v663_v49 = vsel %vm255_vm3, %v661_v47, 0.0  ;;  %v662_v50 = vmul.f32 %v1122_v48, %v1380_v45 }
 0x580   :  { %664 = vadd.xlane.f32.xlu0 %v663_v49 }
 0x581   :  { %v666_v51 = vsel %vm255_vm3, %v662_v50, 0.0 }
 0x582   :  { %667 = vadd.xlane.f32.xlu1 %v666_v51 }
 0x593   :  { %1109 = vrot.lane.b32.xlu1 %v1098_v16, %s1215_s2 }
 0x596   :  { %1104 = vrot.lane.b32.xlu0 %v1093_v0, %s1215_s2 }
 0x60d   :  { %v665_v54 = vpop.xlane.xlu0 %664 }
 0x60e   :  { %v669_v55 = vrot.slane %v665_v54, 4 }
 0x60f   :  { %v668_v56 = vpop.xlane.xlu1 %667 }
 0x610   :  { %v670_v57 = vmax.f32 %v665_v54, %v669_v55  ;;  %v675_v58 = vrot.slane %v668_v56, 4 }
 0x611   :  { %v1105_v59 = vpop.permute.xlu0 %1104 }
 0x612   :  { %v671_v60 = vrot.slane %v670_v57, 2  ;;  %v676_v61 = vmax.f32 %v668_v56, %v675_v58  ;;  %v1107_v62 = vunpack.i.h.bf16 %v1105_v59  ;;  %v1106_v63 = vunpack.i.l.bf16 %v1105_v59 }
 0x613   :  { %v1110_v1 = vpop.permute.xlu1 %1109 }
 0x614   :  { %v672_v2 = vmax.f32 %v670_v57, %v671_v60  ;;  %v677_v3 = vrot.slane %v676_v61, 2  ;;  %v1064_v4 = vpack.c.bf16 %v1107_v62, %v1106_v63  ;;  %v1112_v5 = vunpack.i.h.bf16 %v1110_v1 }
 0x615   :  { %v1111_v6 = vunpack.i.l.bf16 %v1110_v1 }
 0x616   :  { %v673_v7 = vrot.slane %v672_v2, 1  ;;  %v678_v8 = vmax.f32 %v676_v61, %v677_v3  ;;  %1065 = vmatpush3.bf16.msra.mxu1 %v1064_v4 }
 0x617   :  { %v1067_v0 = vpack.c.bf16 %v1112_v5, %v1111_v6  ;;  %1066 = vmatprep.subr.bf16.mxu1 %v1213_v10 }
 0x618   :  { %v674_v9 = vmax.f32 %v672_v2, %v673_v7  ;;  %v679_v12 = vrot.slane %v678_v8, 1 }
 0x61a   :  { %v681_v13 = vsub.f32 %v665_v54, %v674_v9  ;;  %v680_v14 = vmax.f32 %v678_v8, %v679_v12  ;;  %1068 = vmatpush3.bf16.msra.mxu1 %v1067_v0 }
 0x61c   :  { %v683_v15 = vmul.f32 1.442695, %v681_v13  ;;  %v682_v16 = vsub.f32 %v668_v56, %v680_v14 }
 0x61e   :  { %1123 = vpow2.f32 %v683_v15  ;;  %v685_v17 = vmul.f32 1.442695, %v682_v16 }
 0x620   :  { %1125 = vpow2.f32 %v685_v17 }
 0x628   :  { %v1124_v18 = vpop.eup %1123 }
 0x629   :  { %v687_v19 = vrot.slane %v1124_v18, 4 }
 0x62a   :  { %v1126_v20 = vpop.eup %1125 }
 0x62b   :  { %v688_v21 = vadd.f32 %v1124_v18, %v687_v19  ;;  %v693_v22 = vrot.slane %v1126_v20, 4 }
 0x62d   :  { %v689_v23 = vrot.slane %v688_v21, 2  ;;  %v694_v24 = vadd.f32 %v1126_v20, %v693_v22 }
 0x62f   :  { %v690_v27 = vadd.f32 %v689_v23, %v688_v21  ;;  %v695_v28 = vrot.slane %v694_v24, 2 }
 0x631   :  { %v696_v10 = vadd.f32 %v695_v28, %v694_v24  ;;  %v691_v25 = vrot.slane %v690_v27, 1 }
 0x633   :  { %v692_v26 = vadd.f32 %v691_v25, %v690_v27  ;;  %v697_v29 = vrot.slane %v696_v10, 1 }
 0x635   :  { %v698_v32 = vadd.f32 %v697_v29, %v696_v10  ;;  %1127 = vrcp.f32 %v692_v26 }
 0x637   :  { %1129 = vrcp.f32 %v698_v32 }
 0x63f   :  { %v1128_v34 = vpop.eup %1127 }
 0x640   :  { %v701_v36 = vmul.f32 %v1128_v34, %v1124_v18 }
 0x641   :  { %v1130_v37 = vpop.eup %1129 }
 0x642   :  { %v702_v39 = vmul.f32 %v1130_v37, %v1126_v20  ;;  %v703_v40 = vmul.f32 %v701_v36, %v1332_v38 }
 0x644   :  { %v704_v41 = vmul.f32 %v702_v39, %v1328_v33  ;;  %v705_v42 = vsel %vm255_vm3, %v703_v40, 0.0 }
 0x645   :  { %v706_v43 = vrot.slane %v705_v42, 4 }
 0x646   :  { %v712_v44 = vsel %vm255_vm3, %v704_v41, 0.0 }
 0x647   :  { %v707_v46 = vadd.f32 %v706_v43, %v705_v42  ;;  %v713_v47 = vrot.slane %v712_v44, 4 }
 0x649   :  { %v708_v48 = vrot.slane %v707_v46, 2  ;;  %v714_v49 = vadd.f32 %v713_v47, %v712_v44 }
 0x64b   :  { %v709_v50 = vadd.f32 %v708_v48, %v707_v46  ;;  %v715_v51 = vrot.slane %v714_v49, 2 }
 0x64d   :  { %v710_v54 = vrot.slane %v709_v50, 1  ;;  %v716_v55 = vadd.f32 %v715_v51, %v714_v49 }
 0x64f   :  { %v717_v56 = vrot.slane %v716_v55, 1  ;;  %v711_v57 = vadd.f32 %v710_v54, %v709_v50 }
 0x651   :  { %v718_v58 = vadd.f32 %v717_v56, %v716_v55 }
 0x653   :  { %v722_v38 = vsel %vm721_vm7, %v718_v58, %v711_v57 }
 0x654   :  { %1029 = vmatmul.mubr.msk.f32.vlgmr.msra.gmra.mrb[4].mxu1 %vm255_vm3, %v722_v38 }
 0x727   :  { %v803_v33 = vpop.f32.mrb[4].mxu1 }
 0x728   :  { %v814_v59 = vrot.slane %v803_v33, %v1368_v31  ;;  %v1030_v60 = vpop.f32.mrb[5].mxu1 }
 0x72a   :  { %v815_v61 = vcombine.high %v814_v59, %v814_v59  ;;  %v822_v62 = vrot.slane %v814_v59, %v1368_v31 }
 0x72c   :  { %v829_v63 = vrot.slane %v815_v61, %v1368_v31  ;;  %v833_v1 = vrot.slane %v822_v62, %v1372_v35 }
 0x72e   :  { %838 = vrot.lane.b32.xlu0 %v833_v1, %s1215_s2  ;;  %v837_v2 = vrot.slane %v829_v63, %v1372_v35 }
 0x730   :  { %840 = vrot.lane.b32.xlu1 %v837_v2, %s1215_s2 }
 0x7a0   :  { %v839_v3 = vpop.permute.xlu0 %838 }
 0x7a1   :  { %v844_v4 = vadd.f32 %v839_v3, %v1346_v53 }
 0x7a2   :  { %v841_v5 = vpop.permute.xlu1 %840 }
 0x7a3   :  { %1131 = vtanh.f32 %v844_v4  ;;  %v845_v6 = vadd.f32 %v1344_v52, %v841_v5 }
 0x7a5   :  { %1133 = vtanh.f32 %v845_v6 }
 0x7ad   :  { %v1132_v7 = vpop.eup %1131 }
 0x7ae   :  { %v848_v8 = vmul.f32 %v1132_v7, %v1380_v45 }
 0x7af   :  { %v1134_v31 = vpop.eup %1133 }
 0x7b0   :  { %852 = vrot.lane.b32.xlu0 %v848_v8, %s1214_s19  ;;  %v849_v0 = vmul.f32 %v1134_v31, %v1380_v45 }
 0x7b2   :  { %854 = vrot.lane.b32.xlu1 %v849_v0, %s1214_s19 }
 0x822   :  { %v853_v35 = vpop.permute.xlu0 %852 }
 0x823   :  { %v858_v9 = vsel %vm255_vm3, %v853_v35, 0.0 }
 0x824   :  { %859 = vadd.xlane.f32.xlu0 %v858_v9  ;;  %v855_v53 = vpop.permute.xlu1 %854 }
 0x825   :  { %v861_v12 = vsel %vm255_vm3, %v855_v53, 0.0 }
 0x826   :  { %862 = vadd.xlane.f32.xlu1 %v861_v12 }
 0x827   :  { %1168 = shalt.err (!%p1165_p12)
}
 0x828   :  { %s1169_s10 = scalar_lea.hbm %s1444_s7, 32 }
 0x829   :  { %p1170_p13 = scmp.ne.s32.totalorder %s1444_s7, %s1169_s10  ;;  %p1173_p0 = scmp.lt.u32.totalorder %s1169_s10, %s1444_s7 }
 0x82b   :  { %p1175_p1 = pnand %p1173_p0, %p1170_p13 }
 0x82d   :  { %1178 = shalt.err (!%p1175_p1)
}
 0x82e   :  { %899 = dma.vmem_to_hbm [thread:$0]  %s897_s29, 32, %s1444_s7, [#allocation7]   ;;  %v867_v52 = vand.u32 127, %v625_v11  ;;  %vm878_vm8 = vcmask 58368  }
 0x82f   :  { %s1220_s4 = smov [#allocation5]  }
 0x830   :  { %v870_v45 = vsub.s32 %v867_v52, %v1365_v30  ;;  %s886_s17 = sshll.u32 %s1220_s4, 4  ;;  %s887_s17 = int_to_ptr.vmem [resolvable:$true] %s886_s17 }
 0x831   :  { %s1179_s18 = scalar_lea.vmem %s887_s17, 32  ;;  %p1184_p3 = scmp.lt.s32.totalorder %s887_s17, %s887_s17 }
 0x832   :  { %p1180_p2 = scmp.ne.s32.totalorder %s887_s17, %s1179_s18  ;;  %p1185_p4 = scmp.lt.s32.totalorder %s1179_s18, %s1179_s18 }
 0x834   :  { %p1186_p5 = por %p1185_p4, %p1184_p3 }
 0x836   :  { %p1187_p6 = pnand %p1186_p5, %p1180_p2 }
 0x8b1   :  { %v860_v13 = vpop.xlane.xlu0 %859 }
 0x8b2   :  { %v871_v15 = vrot.slane %v860_v13, %v870_v45 }
 0x8b3   :  { %v863_v14 = vpop.xlane.xlu1 %862 }
 0x8b4   :  { %v875_v16 = vrot.slane %v863_v14, %v870_v45 }
 0x8b6   :  { %v876_v17 = vsel %vm721_vm7, %v875_v16, %v871_v15 }
 0x8b7   :  { %879 = vst.msk [vmem:[#allocation5] sm:$0x3] %vm878_vm8, %v876_v17 }
 0x8b8   :  { %1190 = shalt.err (!%p1187_p6)
}
 0x8b9   :  { %s1191_s20 = scalar_lea.hbm %s1443_s6, 32 }
 0x8ba   :  { %p1192_p7 = scmp.ne.s32.totalorder %s1443_s6, %s1191_s20  ;;  %p1195_p8 = scmp.lt.u32.totalorder %s1191_s20, %s1443_s6 }
 0x8bc   :  { %p1197_p9 = pnand %p1195_p8, %p1192_p7 }
 0x8be   :  { %1200 = shalt.err (!%p1197_p9)
}
 0x8bf   :  { %889 = dma.vmem_to_hbm [thread:$0]  %s887_s17, 32, %s1443_s6, [#allocation4]  }
 0x8c0   :  { %1203 = dma.done.wait [#allocation4], 32  }
 0x8c1   :  { %1204 = vsyncadd [#allocation4], 4294967264 }
 0x8c2   :  { %1205 = dma.done.wait [#allocation7], 32  }
 0x8c3   :  { %1206 = vsyncadd [#allocation7], 4294967264 }
 0x8c4   :  { %906 = vsyncpa [#allocation3], 1 }
 0x8c5   :  { %907 = vsyncpa [#allocation4], 1 }
 0x8c6   :  { %908 = vsyncpa [#allocation7], 1 }

</bundles_post_ra>
